<compile_context>
chip_gen: v7x
topology: tpu7x:2x2x1
jax: 0.10.0
libtpu: 0.0.40
codegen_flags: <defaults>
</compile_context>

<pallas_src>
import functools
import math

import jax
import jax.numpy as jnp
from jax import lax
from jax.experimental import pallas as pl
from jax.experimental.pallas import tpu as pltpu


_LOG_CHUNK = 4       # losses folded into one log() via a product (EUP relief)
_STRIP_TARGET = 256  # rows per in-kernel strip (bounds live f32 temporaries)
_ACC_ROWS = 8        # sublane height of the resident accumulator block


def _cdiv(a, b):
    return -(-a // b)


def _pick_strip(tile_h, target=_STRIP_TARGET):
    """Largest multiple of 8 that divides tile_h and is <= target."""
    if tile_h <= target:
        return tile_h
    best = 8
    for d in range(8, target + 1, 8):
        if tile_h % d == 0:
            best = d
    return best


def _hv_loss_kernel(*refs, n, slack, strip_h, log_chunk):
    """refs = (loss_ref_0 ... loss_ref_{n-1}, out_ref).

    Each loss block is (tile_h, W); the out block is (_ACC_ROWS, W) and its
    block index is constant along the sequential grid axis, so it stays
    resident in VMEM and acts as the accumulator (one HBM writeback per
    parallel slot).
    """
    loss_refs = refs[:n]
    out_ref = refs[n]
    seq = pl.program_id(1)

    tile_h, w = loss_refs[0].shape
    n_strips = tile_h // strip_h

    def strip_partial(r0):
        # Elementwise max over the n losses (VPU).  Refs are re-read per pass
        # so only strip-sized f32 temporaries are live at any point.
        mx = loss_refs[0][pl.ds(r0, strip_h), :].astype(jnp.float32)
        for r in loss_refs[1:]:
            mx = jnp.maximum(mx, r[pl.ds(r0, strip_h), :].astype(jnp.float32))

        # eta is used by value only in the forward pass (PyTorch .detach()).
        # TODO(synk): for training-grad parity, wrap in custom_vjp with
        # lax.stop_gradient(eta).
        eta = jnp.float32(slack) * mx

        # loss_hv = -sum_i log(eta - x_i)
        #         = -sum_{chunks} log( prod_{i in chunk} (eta - x_i) )
        # Chunked product keeps EUP log traffic at ceil(n/log_chunk) per elem.
        strip_loss = None
        for c0 in range(0, n, log_chunk):
            prod = eta - loss_refs[c0][pl.ds(r0, strip_h), :].astype(jnp.float32)
            for idx in range(c0 + 1, min(c0 + log_chunk, n)):
                prod = prod * (
                    eta - loss_refs[idx][pl.ds(r0, strip_h), :].astype(jnp.float32))
            term = -jnp.log(prod)
            strip_loss = term if strip_loss is None else strip_loss + term

        # Fold strip rows into _ACC_ROWS rows (vreg-aligned static slices, VPU).
        folded = strip_loss[0:_ACC_ROWS, :]
        for r in range(1, strip_h // _ACC_ROWS):
            folded = folded + strip_loss[r * _ACC_ROWS:(r + 1) * _ACC_ROWS, :]
        return folded

    @pl.when(seq == 0)
    def _():
        out_ref[...] = jnp.zeros_like(out_ref)

    if n_strips == 1:
        out_ref[...] += strip_partial(0)
    else:
        def body(s, carry):
            r0 = pl.multiple_of(s * strip_h, strip_h)
            return carry + strip_partial(r0)

        out_ref[...] += lax.fori_loop(
            0, n_strips, body, jnp.zeros((_ACC_ROWS, w), jnp.float32))


def hv_loss(*losses, slack=1.1, tile_h=None, num_parallel=None):
    """Pallas implementation of HVLoss.forward(*losses). Losses may be any
    (identical) shape/dtype; the wrapper streams them lane-densely."""
    n = len(losses)
    assert n >= 1
    shape = losses[0].shape
    for l in losses:
        assert l.shape == shape, "all losses must share the same shape"
    e_true = int(math.prod(shape)) if shape else 1

    # --- VMEM budget from the actual chip (fallback = v7x-conservative 64 MiB).
    vmem_cap = 64 << 20
    try:
        vmem_cap = int(getattr(pltpu.get_tpu_info(), "vmem_capacity_bytes", vmem_cap))
    except Exception:
        pass

    # --- Lane-dense layout: flatten to (rows, lane_w) with lane_w % 128 == 0.
    lane_w = None
    for cand in (512, 256, 128):
        if e_true % (cand * 8) == 0:
            lane_w = cand
            break
    if lane_w is None:
        lane_w = 512 if e_true >= 512 * 8 else 128
    rows_raw = _cdiv(e_true, lane_w)

    if num_parallel is None:
        # 2-way split of the row blocks; harmless on single-TensorCore chips.
        # TODO(synk): use pltpu.CORE_PARALLEL / pl.core_map for guaranteed
        # dual-TC sharding on v7x once the core count is queryable here.
        num_parallel = 2 if rows_raw >= 16 else 1
    assert num_parallel >= 1
    per_slot = _cdiv(rows_raw, num_parallel)

    # --- Tile selection: budget includes the strip-sized f32 temporaries.
    itemsize_sum = sum(jnp.dtype(l.dtype).itemsize for l in losses)
    bytes_in_per_row = lane_w * itemsize_sum
    strip_for_budget = min(_STRIP_TARGET, max(8, per_slot))
    temp_bytes_budget = 6 * strip_for_budget * lane_w * 4
    vmem_budget = int(vmem_cap * 0.40)
    input_budget = max(vmem_budget - temp_bytes_budget, 2 * 8 * bytes_in_per_row)
    max_tile_rows = max(8, input_budget // (2 * bytes_in_per_row))  # double-buffered

    if tile_h is None:
        cap = max_tile_rows
        if per_slot >= 32:
            # keep >= 2 sequential steps per slot so the pipeline overlaps DMA
            cap = min(cap, max(8, per_slot // 2))
        t = min(cap, max(per_slot, 8))
        if t >= _STRIP_TARGET:
            tile_h = (t // _STRIP_TARGET) * _STRIP_TARGET
        else:
            tile_h = max(8, (t // 8) * 8)
    assert tile_h % 8 == 0 and tile_h >= 8

    strip_h = _pick_strip(tile_h)
    steps = max(1, _cdiv(rows_raw, num_parallel * tile_h))
    padded_rows = num_parallel * steps * tile_h
    e_pad = padded_rows * lane_w
    pad_count = e_pad - e_true

    # --- Prepare inputs: free reshape when possible, else pad with a value whose
    #     contribution is ~0 (eta - pad == 1); its exact contribution is
    #     subtracted again after the kernel.
    if pad_count > 0:
        pad_val = 1.0 / (slack - 1.0) if abs(slack - 1.0) > 1e-12 else 1.0
        prepared = [
            jnp.pad(l.reshape(-1), (0, pad_count),
                    constant_values=pad_val).reshape(padded_rows, lane_w)
            for l in losses
        ]
    else:
        pad_val = 0.0
        prepared = [l.reshape(padded_rows, lane_w) for l in losses]

    in_spec = pl.BlockSpec((tile_h, lane_w), lambda p, i: (p * steps + i, 0))
    out_spec = pl.BlockSpec((_ACC_ROWS, lane_w), lambda p, i: (p, 0))

    kernel = functools.partial(
        _hv_loss_kernel, n=n, slack=float(slack),
        strip_h=strip_h, log_chunk=_LOG_CHUNK)

    temp_bytes = 6 * strip_h * lane_w * 4
    est_vmem = (2 * tile_h * bytes_in_per_row          # double-buffered inputs
                + 2 * _ACC_ROWS * lane_w * 4           # resident accumulator
                + temp_bytes)                          # strip f32 temporaries
    vmem_limit = int(min(max(est_vmem + (8 << 20), 16 << 20), int(0.6 * vmem_cap)))
    vmem_limit = max(vmem_limit, est_vmem + (1 << 20))

    n_chunks = _cdiv(n, _LOG_CHUNK)
    cost = pl.CostEstimate(
        flops=int(3 * n * e_pad),
        transcendentals=int(n_chunks * e_pad),
        bytes_accessed=int(e_pad * itemsize_sum
                           + num_parallel * _ACC_ROWS * lane_w * 4),
    )

    partials = pl.pallas_call(
        kernel,
        out_shape=jax.ShapeDtypeStruct((num_parallel * _ACC_ROWS, lane_w),
                                       jnp.float32),
        grid_spec=pltpu.PrefetchScalarGridSpec(
            num_scalar_prefetch=0,
            grid=(num_parallel, steps),
            in_specs=[in_spec] * n,
            out_specs=out_spec,
        ),
        compiler_params=pltpu.CompilerParams(
            dimension_semantics=("parallel", "arbitrary"),
            vmem_limit_bytes=vmem_limit,
        ),
        cost_estimate=cost,
    )(*prepared)

    total = jnp.sum(partials)

    if pad_count > 0 and abs(slack - 1.0) > 1e-12:
        # Subtract the deterministic contribution of the pad elements, replicated
        # with the same f32 arithmetic (per-dtype upcast + chunked product) as
        # the kernel, so padding does not bias the result.
        pvs = [jnp.asarray(pad_val, dtype=l.dtype).astype(jnp.float32)
               for l in losses]
        mx = functools.reduce(jnp.maximum, pvs)
        eta_p = jnp.float32(slack) * mx
        diffs = [eta_p - p for p in pvs]
        corr = jnp.float32(0.0)
        for c0 in range(0, n, _LOG_CHUNK):
            prod = diffs[c0]
            for idx in range(c0 + 1, min(c0 + _LOG_CHUNK, n)):
                prod = prod * diffs[idx]
            corr = corr - jnp.log(prod)
        total = total - jnp.float32(pad_count) * corr

    # mean over the elements of loss_hv (original shape), NOT over N
    return total / jnp.float32(e_true)


def _hv_loss_ref(*losses, slack=1.1):
    x = jnp.stack([l.astype(jnp.float32) for l in losses], axis=0)
    max_loss = jnp.max(x, axis=0)
    eta = slack * max_loss
    loss_hv = -jnp.sum(jnp.log(eta[None] - x), axis=0)
    return jnp.mean(loss_hv)


if __name__ == "__main__":
    key = jax.random.PRNGKey(0)
    k0, k1, k2, k3, k4 = jax.random.split(key, 5)

    # --- Test A: module-like small 4-D loss maps (batch=2, ch=4, 16x16), mixed dtype.
    shape_a = (2, 4, 16, 16)
    a0 = jax.random.uniform(k0, shape_a, dtype=jnp.float32) + 0.5
    a1 = jax.random.uniform(k1, shape_a, dtype=jnp.float32) + 0.5
    a2 = (jax.random.uniform(k2, shape_a, dtype=jnp.float32) + 0.5).astype(jnp.bfloat16)
    ref_a = _hv_loss_ref(a0, a1, a2, slack=1.1)
    out_a = jax.block_until_ready(hv_loss(a0, a1, a2, slack=1.1))
    assert jnp.isfinite(out_a), f"non-finite output: {out_a}"
    assert jnp.allclose(out_a, ref_a, rtol=1e-4, atol=1e-4), (out_a, ref_a)

    # --- Test B: awkward shape -> lane-dense flatten + zero-contribution padding.
    shape_b = (3, 5, 7)
    b0 = jax.random.uniform(k3, shape_b, dtype=jnp.float32) + 0.5
    b1 = jax.random.uniform(k4, shape_b, dtype=jnp.float32) + 0.5
    ref_b = _hv_loss_ref(b0, b1, slack=1.1)
    out_b = jax.block_until_ready(hv_loss(b0, b1, slack=1.1))
    assert jnp.isfinite(out_b), f"non-finite output: {out_b}"
    assert jnp.allclose(out_b, ref_b, rtol=1e-4, atol=1e-4), (out_b, ref_b)

    # --- Test C: larger 2-D map -> 2-way parallel axis + multi-step accumulation.
    kc0, kc1, kc2 = jax.random.split(k0, 3)
    shape_c = (256, 512)
    c0 = jax.random.uniform(kc0, shape_c, dtype=jnp.float32) + 0.5
    c1 = jax.random.uniform(kc1, shape_c, dtype=jnp.float32) + 0.5
    c2 = jax.random.uniform(kc2, shape_c, dtype=jnp.float32) + 0.5
    ref_c = _hv_loss_ref(c0, c1, c2, slack=1.1)
    out_c = jax.block_until_ready(hv_loss(c0, c1, c2, slack=1.1))
    assert jnp.allclose(out_c, ref_c, rtol=1e-4, atol=1e-4), (out_c, ref_c)

    # --- Test D: explicit big tile -> in-kernel strip fori_loop path + row padding.
    out_d = jax.block_until_ready(
        hv_loss(c0, c1, c2, slack=1.1, tile_h=512, num_parallel=1))
    assert jnp.allclose(out_d, ref_c, rtol=1e-4, atol=1e-4), (out_d, ref_c)

    print("KERNEL_OK")
</pallas_src>

<mosaic_0001>
module attributes {stable_mosaic.version = 11 : i64} {
  func.func @_hv_loss_kernel(%arg0: i32, %arg1: i32, %arg2: memref<8x256xf32, #tpu.memory_space<vmem>>, %arg3: memref<8x256xf32, #tpu.memory_space<vmem>>, %arg4: memref<8x256xbf16, #tpu.memory_space<vmem>>, %arg5: memref<8x256xf32, #tpu.memory_space<vmem>>) attributes {dimension_semantics = [#tpu.dimension_semantics<parallel>, #tpu.dimension_semantics<arbitrary>], iteration_bounds = array<i64: 1, 1>, scalar_prefetch = 0 : i64, scratch_operands = 0 : i64, tpu.core_type = #tpu.core_type<tc>, window_params = [{transform_indices = @transform_0, window_bounds = array<i64: 8, 256>}, {transform_indices = @transform_1, window_bounds = array<i64: 8, 256>}, {transform_indices = @transform_2, window_bounds = array<i64: 8, 256>}, {transform_indices = @transform_3, window_bounds = array<i64: 8, 256>}]} {
    %c0_i32 = arith.constant 0 : i32
    %0 = arith.cmpi eq, %arg1, %c0_i32 : i32
    %1 = arith.extui %0 : i1 to i32
    %c0_i32_0 = arith.constant 0 : i32
    %2 = arith.cmpi ne, %1, %c0_i32_0 : i32
    scf.if %2 {
      %cst_17 = arith.constant 0.000000e+00 : f32
      %26 = vector.broadcast %cst_17 : f32 to vector<8x256xf32>
      %c0_18 = arith.constant 0 : index
      %c0_19 = arith.constant 0 : index
      %27 = vector.load %arg5[%c0_18, %c0_19] : memref<8x256xf32, #tpu.memory_space<vmem>>, vector<8x256xf32>
      tpu.vector_store %arg5[%c0_18, %c0_19], %26 {strides = array<i32>} : memref<8x256xf32, #tpu.memory_space<vmem>>, vector<8x256xf32>,
    } else {
    }
    %c0 = arith.constant 0 : index
    %c0_1 = arith.constant 0 : index
    %3 = vector.load %arg5[%c0, %c0_1] : memref<8x256xf32, #tpu.memory_space<vmem>>, vector<8x256xf32>
    %c0_2 = arith.constant 0 : index
    %c0_3 = arith.constant 0 : index
    %4 = vector.load %arg2[%c0_2, %c0_3] : memref<8x256xf32, #tpu.memory_space<vmem>>, vector<8x256xf32>
    %c0_4 = arith.constant 0 : index
    %c0_5 = arith.constant 0 : index
    %5 = vector.load %arg3[%c0_4, %c0_5] : memref<8x256xf32, #tpu.memory_space<vmem>>, vector<8x256xf32>
    %6 = arith.maximumf %4, %5 : vector<8x256xf32>
    %c0_6 = arith.constant 0 : index
    %c0_7 = arith.constant 0 : index
    %7 = vector.load %arg4[%c0_6, %c0_7] : memref<8x256xbf16, #tpu.memory_space<vmem>>, vector<8x256xbf16>
    %8 = arith.extf %7 : vector<8x256xbf16> to vector<8x256xf32>
    %9 = arith.maximumf %6, %8 : vector<8x256xf32>
    %cst = arith.constant 1.100000e+00 : f32
    %10 = vector.broadcast %cst : f32 to vector<8x256xf32>
    %11 = arith.mulf %10, %9 : vector<8x256xf32>
    %c0_8 = arith.constant 0 : index
    %c0_9 = arith.constant 0 : index
    %12 = vector.load %arg2[%c0_8, %c0_9] : memref<8x256xf32, #tpu.memory_space<vmem>>, vector<8x256xf32>
    %13 = arith.subf %11, %12 : vector<8x256xf32>
    %c0_10 = arith.constant 0 : index
    %c0_11 = arith.constant 0 : index
    %14 = vector.load %arg3[%c0_10, %c0_11] : memref<8x256xf32, #tpu.memory_space<vmem>>, vector<8x256xf32>
    %15 = arith.subf %11, %14 : vector<8x256xf32>
    %16 = arith.mulf %13, %15 : vector<8x256xf32>
    %c0_12 = arith.constant 0 : index
    %c0_13 = arith.constant 0 : index
    %17 = vector.load %arg4[%c0_12, %c0_13] : memref<8x256xbf16, #tpu.memory_space<vmem>>, vector<8x256xbf16>
    %18 = arith.extf %17 : vector<8x256xbf16> to vector<8x256xf32>
    %19 = arith.subf %11, %18 : vector<8x256xf32>
    %20 = arith.mulf %16, %19 : vector<8x256xf32>
    %21 = math.log %20 : vector<8x256xf32>
    %cst_14 = arith.constant 0.000000e+00 : f32
    %22 = vector.broadcast %cst_14 : f32 to vector<8x256xf32>
    %23 = arith.subf %22, %21 : vector<8x256xf32>
    %24 = arith.addf %3, %23 : vector<8x256xf32>
    %c0_15 = arith.constant 0 : index
    %c0_16 = arith.constant 0 : index
    %25 = vector.load %arg5[%c0_15, %c0_16] : memref<8x256xf32, #tpu.memory_space<vmem>>, vector<8x256xf32>
    tpu.vector_store %arg5[%c0_15, %c0_16], %24 {strides = array<i32>} : memref<8x256xf32, #tpu.memory_space<vmem>>, vector<8x256xf32>,
    return
  }
  func.func @transform_0(%arg0: i32, %arg1: i32) -> (i32, i32) {
    %c1_i32 = arith.constant 1 : i32
    %0 = arith.muli %arg0, %c1_i32 : i32
    %1 = arith.addi %0, %arg1 : i32
    %c0_i32 = arith.constant 0 : i32
    %c0_i32_0 = arith.constant 0 : i32
    return %1, %c0_i32 : i32, i32
  }
  func.func @transform_1(%arg0: i32, %arg1: i32) -> (i32, i32) {
    %c1_i32 = arith.constant 1 : i32
    %0 = arith.muli %arg0, %c1_i32 : i32
    %1 = arith.addi %0, %arg1 : i32
    %c0_i32 = arith.constant 0 : i32
    %c0_i32_0 = arith.constant 0 : i32
    return %1, %c0_i32 : i32, i32
  }
  func.func @transform_2(%arg0: i32, %arg1: i32) -> (i32, i32) {
    %c1_i32 = arith.constant 1 : i32
    %0 = arith.muli %arg0, %c1_i32 : i32
    %1 = arith.addi %0, %arg1 : i32
    %c0_i32 = arith.constant 0 : i32
    %c0_i32_0 = arith.constant 0 : i32
    return %1, %c0_i32 : i32, i32
  }
  func.func @transform_3(%arg0: i32, %arg1: i32) -> (i32, i32) {
    %c0_i32 = arith.constant 0 : i32
    %c0_i32_0 = arith.constant 0 : i32
    return %arg0, %c0_i32 : i32, i32
  }
}

</mosaic_0001>

<bundles_post_ra>
// kernel: tpu_custom_call.1
= control target key start
LH: loop header
LB: loop body
LE: loop exit
PB: predicated region body
PF: predicated region fallthrough
CT: control target
= control target key end

     0   :  { %8 = vsyncpa [#allocation3], 0  ;;  %s297_s0 = inlined_call_operand.hbm [shape: f32[8,256], index: 0, kind: input, shape index: {}]   ;;  %s298_s1 = inlined_call_operand.hbm [shape: f32[8,256], index: 1, kind: input, shape index: {}]   ;;  %s299_s2 = inlined_call_operand.hbm [shape: bf16[8,256], index: 2, kind: input, shape index: {}]   ;;  %s300_s3 = inlined_call_operand.hbm [shape: f32[8,256], index: 3, kind: output, shape index: {}]  }
   0x1   :  { %9 = vsyncpa [#allocation6], 0 }
   0x2   :  { %10 = vsyncpa [#allocation4], 0  ;;  %s225_s12 = smov [#allocation5]   ;;  %s226_s14 = smov [#allocation2]  }
   0x3   :  { %s35_s13 = sshll.u32 %s225_s12, 4  ;;  %s21_s15 = sshll.u32 %s226_s14, 4  ;;  %s36_s13 = int_to_ptr.vmem [resolvable:$true] %s35_s13  ;;  %s22_s15 = int_to_ptr.vmem [resolvable:$true] %s21_s15 }
   0x4   :  { %s131_s18 = scalar_lea.hbm %s298_s1, 256 }
   0x5   :  { %p132_p0 = scmp.ne.s32.totalorder %s298_s1, %s131_s18  ;;  %p135_p1 = scmp.lt.u32.totalorder %s131_s18, %s298_s1 }
   0x7   :  { %p137_p2 = pnand %p135_p1, %p132_p0 }
   0x9   :  { %140 = shalt.err (!%p137_p2)
}
   0xa   :  { %s141_s23 = scalar_lea.vmem %s36_s13, 256  ;;  %p146_p4 = scmp.lt.s32.totalorder %s36_s13, %s36_s13 }
   0xb   :  { %p142_p3 = scmp.ne.s32.totalorder %s36_s13, %s141_s23  ;;  %p147_p5 = scmp.lt.s32.totalorder %s141_s23, %s141_s23 }
   0xd   :  { %p148_p6 = por %p147_p5, %p146_p4 }
   0xf   :  { %p149_p7 = pnand %p148_p6, %p142_p3 }
  0x11   :  { %152 = shalt.err (!%p149_p7)
}
  0x12   :  { %38 = dma.hbm_to_vmem [thread:$0]  %s298_s1, 256, %s36_s13, [#allocation6]  }
  0x13   :  { %s153_s28 = scalar_lea.hbm %s297_s0, 256 }
  0x14   :  { %p154_p8 = scmp.ne.s32.totalorder %s297_s0, %s153_s28  ;;  %p157_p9 = scmp.lt.u32.totalorder %s153_s28, %s297_s0 }
  0x16   :  { %p159_p10 = pnand %p157_p9, %p154_p8 }
  0x18   :  { %162 = shalt.err (!%p159_p10)
}
  0x19   :  { %s163_s6 = scalar_lea.vmem %s22_s15, 256  ;;  %p168_p12 = scmp.lt.s32.totalorder %s22_s15, %s22_s15 }
  0x1a   :  { %p164_p11 = scmp.ne.s32.totalorder %s22_s15, %s163_s6  ;;  %p169_p13 = scmp.lt.s32.totalorder %s163_s6, %s163_s6 }
  0x1c   :  { %p170_p0 = por %p169_p13, %p168_p12 }
  0x1e   :  { %p171_p1 = pnand %p170_p0, %p164_p11 }
  0x20   :  { %174 = shalt.err (!%p171_p1)
}
  0x21   :  { %24 = dma.hbm_to_vmem [thread:$0]  %s297_s0, 256, %s22_s15, [#allocation3]  }
  0x22   :  { %s227_s8 = smov [#allocation7]   ;;  %s175_s12 = scalar_lea.hbm %s299_s2, 128 }
  0x23   :  { %s49_s9 = sshll.u32 %s227_s8, 4  ;;  %p176_p2 = scmp.ne.s32.totalorder %s299_s2, %s175_s12  ;;  %s50_s9 = int_to_ptr.vmem [resolvable:$true] %s49_s9 }
  0x24   :  { %p179_p3 = scmp.lt.u32.totalorder %s175_s12, %s299_s2 }
  0x26   :  { %p181_p4 = pnand %p179_p3, %p176_p2 }
  0x28   :  { %184 = shalt.err (!%p181_p4)
}
  0x29   :  { %s185_s18 = scalar_lea.vmem %s50_s9, 128  ;;  %p190_p6 = scmp.lt.s32.totalorder %s50_s9, %s50_s9 }
  0x2a   :  { %p186_p5 = scmp.ne.s32.totalorder %s50_s9, %s185_s18  ;;  %p191_p7 = scmp.lt.s32.totalorder %s185_s18, %s185_s18 }
  0x2c   :  { %p192_p8 = por %p191_p7, %p190_p6 }
  0x2e   :  { %p193_p9 = pnand %p192_p8, %p186_p5 }
  0x30   :  { %196 = shalt.err (!%p193_p9)
}
  0x31   :  { %52 = dma.hbm_to_vmem [thread:$0]  %s299_s2, 128, %s50_s9, [#allocation6]  }
  0x32   :  { %219 = dma.done.wait [#allocation3], 256  }
  0x33   :  { %220 = vsyncadd [#allocation3], 4294967040 }
  0x34   :  { %221 = dma.done.wait [#allocation6], 384  }
  0x35   :  { %222 = vsyncadd [#allocation6], 4294966912  ;;  %v73_v0 = vld [vmem:[#allocation2] sm:$0xff]  ;;  %v75_v1 = vld [vmem:[#allocation5] sm:$0xff]  ;;  %s228_s2 = smov [#allocation8]  }
  0x36   :  { %v79_v2 = vld [vmem:[#allocation7] sm:$0xff]  ;;  %v77_v3 = vmax.f32 %v73_v0, %v75_v1  ;;  %v74_v5 = vld [vmem:[#allocation2 + $0x8] sm:$0xff]  ;;  %v76_v6 = vld [vmem:[#allocation5 + $0x8] sm:$0xff]  ;;  %s112_s19 = sshll.u32 %s228_s2, 4  ;;  %s113_s19 = int_to_ptr.vmem [resolvable:$true] %s112_s19 }
  0x37   :  { %v80_v4 = vunpack.c.l.bf16 %v79_v2  ;;  %v81_v7 = vunpack.c.h.bf16 %v79_v2  ;;  %v78_v8 = vmax.f32 %v74_v5, %v76_v6  ;;  %s197_s20 = scalar_lea.vmem %s113_s19, 256  ;;  %p202_p11 = scmp.lt.s32.totalorder %s113_s19, %s113_s19 }
  0x38   :  { %p198_p10 = scmp.ne.s32.totalorder %s113_s19, %s197_s20  ;;  %p203_p12 = scmp.lt.s32.totalorder %s197_s20, %s197_s20 }
  0x39   :  { %v82_v9 = vmax.f32 %v77_v3, %v80_v4  ;;  %v83_v10 = vmax.f32 %v78_v8, %v81_v7 }
  0x3a   :  { %p204_p13 = por %p203_p12, %p202_p11 }
  0x3b   :  { %v84_v11 = vmul.f32 1.1, %v82_v9  ;;  %v85_v12 = vmul.f32 1.1, %v83_v10 }
  0x3c   :  { %p205_p0 = pnand %p204_p13, %p198_p10 }
  0x3d   :  { %v86_v13 = vsub.f32 %v84_v11, %v73_v0  ;;  %v88_v14 = vsub.f32 %v84_v11, %v75_v1  ;;  %v92_v15 = vsub.f32 %v84_v11, %v80_v4  ;;  %v87_v16 = vsub.f32 %v85_v12, %v74_v5 }
  0x3e   :  { %v89_v17 = vsub.f32 %v85_v12, %v76_v6  ;;  %v93_v18 = vsub.f32 %v85_v12, %v81_v7 }
  0x3f   :  { %v90_v19 = vmul.f32 %v88_v14, %v86_v13 }
  0x40   :  { %v91_v20 = vmul.f32 %v89_v17, %v87_v16 }
  0x41   :  { %v94_v21 = vmul.f32 %v92_v15, %v90_v19 }
  0x42   :  { %v95_v22 = vmul.f32 %v93_v18, %v91_v20 }
  0x43   :  { %127 = vlog2.f32 %v94_v21 }
  0x44   :  { %129 = vlog2.f32 %v95_v22 }
  0x4d   :  { %v128_v23 = vpop.eup %127 }
  0x4e   :  { %v130_v24 = vpop.eup %129  ;;  %v97_v25 = vmul.f32 0.6931472, %v128_v23 }
  0x4f   :  { %v99_v26 = vmul.f32 0.6931472, %v130_v24 }
  0x50   :  { %v100_v27 = vsub.f32 0.0, %v97_v25 }
  0x51   :  { %v101_v28 = vsub.f32 0.0, %v99_v26 }
  0x52   :  { %104 = vst [vmem:[#allocation8] sm:$0xff] %v100_v27 }
  0x53   :  { %105 = vst [vmem:[#allocation8 + $0x8] sm:$0xff] %v101_v28 }
  0x54   :  { %208 = shalt.err (!%p205_p0)
}
  0x55   :  { %s209_s23 = scalar_lea.hbm %s300_s3, 256 }
  0x56   :  { %p210_p1 = scmp.ne.s32.totalorder %s300_s3, %s209_s23  ;;  %p213_p2 = scmp.lt.u32.totalorder %s209_s23, %s300_s3 }
  0x58   :  { %p215_p3 = pnand %p213_p2, %p210_p1 }
  0x5a   :  { %218 = shalt.err (!%p215_p3)
}
  0x5b   :  { %115 = dma.vmem_to_hbm [thread:$0]  %s113_s19, 256, %s300_s3, [#allocation4]  }
  0x5c   :  { %223 = dma.done.wait [#allocation4], 256  }
  0x5d   :  { %224 = vsyncadd [#allocation4], 4294967040 }
  0x5e   :  { %119 = vsyncpa [#allocation3], 1 }
  0x5f   :  { %120 = vsyncpa [#allocation6], 1 }
  0x60   :  { %121 = vsyncpa [#allocation4], 1 }

</bundles_post_ra>
